<compile_context>
chip_gen: v5e
topology: v5e:2x2
jax: 0.10.0
libtpu: 0.0.40
codegen_flags: <defaults>
</compile_context>

<pallas_src>
import functools

import jax
import jax.numpy as jnp
from jax.experimental import pallas as pl
from jax.experimental.pallas import tpu as pltpu


def _round_up(n: int, m: int) -> int:
    return ((n + m - 1) // m) * m


def thl_ffnn_kernel(x_ref, w1_ref, b1_ref, w2_ref, b2_ref, w3_ref, b3_ref, o_ref):
    # One (TILE_B, *) batch tile per grid step; entire 3-layer MLP fused.
    x = x_ref[...]                                              # bf16 (TILE_B, IN_P)

    # input_layer + ReLU  (bf16 MXU operands, f32 accumulation, f32 elementwise)
    h1 = jnp.dot(x, w1_ref[...], preferred_element_type=jnp.float32) + b1_ref[...]
    h1 = jnp.maximum(h1, 0.0)

    # single hidden layer (nb_hidden_layers=2 -> 1 hidden Linear) + ReLU
    h2 = jnp.dot(h1.astype(jnp.bfloat16), w2_ref[...],
                 preferred_element_type=jnp.float32) + b2_ref[...]
    h2 = jnp.maximum(h2, 0.0)

    # output_layer + Softmax(dim=1) over the lane-dense padded class axis.
    # Padded classes carry a -1e30 bias -> exp underflows to 0 and they drop out.
    logits = jnp.dot(h2.astype(jnp.bfloat16), w3_ref[...],
                     preferred_element_type=jnp.float32) + b3_ref[...]
    m = jnp.max(logits, axis=1, keepdims=True)
    e = jnp.exp(logits - m)
    denom = jnp.sum(e, axis=1, keepdims=True)
    # Divide on the EUP (approx reciprocal) instead of the VPU.
    o_ref[...] = (e * pl.reciprocal(denom, approx=True)).astype(o_ref.dtype)


@functools.partial(jax.jit, static_argnames=("batch_tile",))
def thl_ffnn(x, w1, b1, w2, b2, w3, b3, *, batch_tile: int = 256):
    B, in_size = x.shape
    hid = w1.shape[1]
    out_size = w3.shape[1]

    IN_P = _round_up(in_size, 128)
    HID_P = _round_up(hid, 128)
    OUT_P = _round_up(out_size, 128)
    # Tall batch tiles fill the MXU M dimension and amortize per-step overhead;
    # 16-row granularity keeps bf16 sublane packing happy at tiny batches.
    TILE_B = min(batch_tile, _round_up(B, 16))
    B_P = _round_up(B, TILE_B)

    NEG = jnp.float32(-1e30)

    # Pad + cast (weights -> bf16 for the MXU, biases stay f32).
    x_p = jnp.zeros((B_P, IN_P), jnp.bfloat16).at[:B, :in_size].set(x.astype(jnp.bfloat16))
    w1_p = jnp.zeros((IN_P, HID_P), jnp.bfloat16).at[:in_size, :hid].set(w1.astype(jnp.bfloat16))
    b1_p = jnp.zeros((1, HID_P), jnp.float32).at[:, :hid].set(b1.astype(jnp.float32))
    w2_p = jnp.zeros((HID_P, HID_P), jnp.bfloat16).at[:hid, :hid].set(w2.astype(jnp.bfloat16))
    b2_p = jnp.zeros((1, HID_P), jnp.float32).at[:, :hid].set(b2.astype(jnp.float32))
    w3_p = jnp.zeros((HID_P, OUT_P), jnp.bfloat16).at[:hid, :out_size].set(w3.astype(jnp.bfloat16))
    b3_p = jnp.full((1, OUT_P), NEG, jnp.float32).at[:, :out_size].set(b3.astype(jnp.float32))

    vmem = pltpu.MemorySpace.VMEM
    grid = (B_P // TILE_B,)

    # NOTE: whole-array weight BlockSpecs assume hidden_size fits VMEM (fine up to a few K).
    # For hidden_size >= ~4096 the contraction dim should be K-tiled with an f32 accumulator.
    out_p = pl.pallas_call(
        thl_ffnn_kernel,
        out_shape=jax.ShapeDtypeStruct((B_P, OUT_P), jnp.float32),
        grid=grid,
        in_specs=[
            pl.BlockSpec((TILE_B, IN_P), lambda i: (i, 0), memory_space=vmem),   # x tile
            pl.BlockSpec((IN_P, HID_P), lambda i: (0, 0), memory_space=vmem),    # w1 (resident)
            pl.BlockSpec((1, HID_P), lambda i: (0, 0), memory_space=vmem),       # b1
            pl.BlockSpec((HID_P, HID_P), lambda i: (0, 0), memory_space=vmem),   # w2
            pl.BlockSpec((1, HID_P), lambda i: (0, 0), memory_space=vmem),       # b2
            pl.BlockSpec((HID_P, OUT_P), lambda i: (0, 0), memory_space=vmem),   # w3
            pl.BlockSpec((1, OUT_P), lambda i: (0, 0), memory_space=vmem),       # b3
        ],
        out_specs=pl.BlockSpec((TILE_B, OUT_P), lambda i: (i, 0), memory_space=vmem),
        compiler_params=pltpu.CompilerParams(
            dimension_semantics=("parallel",),  # batch axis -> both TCs on v7x
        ),
    )(x_p, w1_p, b1_p, w2_p, b2_p, w3_p, b3_p)

    return out_p[:B, :out_size]


def thl_ffnn_ref(x, w1, b1, w2, b2, w3, b3):
    # Pure-JAX reference with the same bf16-matmul / f32-accumulate precision.
    h1 = jnp.maximum(
        jnp.dot(x.astype(jnp.bfloat16), w1.astype(jnp.bfloat16),
                preferred_element_type=jnp.float32) + b1, 0.0)
    h2 = jnp.maximum(
        jnp.dot(h1.astype(jnp.bfloat16), w2.astype(jnp.bfloat16),
                preferred_element_type=jnp.float32) + b2, 0.0)
    logits = jnp.dot(h2.astype(jnp.bfloat16), w3.astype(jnp.bfloat16),
                     preferred_element_type=jnp.float32) + b3
    return jax.nn.softmax(logits, axis=1)


def init_linear(key, fan_in, fan_out):
    # Mimic torch.nn.Linear default init: U(-1/sqrt(fan_in), 1/sqrt(fan_in)).
    kw, kb = jax.random.split(key)
    bound = 1.0 / (fan_in ** 0.5)
    w = jax.random.uniform(kw, (fan_in, fan_out), jnp.float32, -bound, bound)
    b = jax.random.uniform(kb, (1, fan_out), jnp.float32, -bound, bound)
    return w, b


if __name__ == "__main__":
    input_size, hidden_size, output_size = 16, 32, 8
    batch = 2

    key = jax.random.PRNGKey(0)
    kx, k1, k2, k3 = jax.random.split(key, 4)

    x = jax.random.normal(kx, (batch, input_size), jnp.float32)
    w1, b1 = init_linear(k1, input_size, hidden_size)
    w2, b2 = init_linear(k2, hidden_size, hidden_size)
    w3, b3 = init_linear(k3, hidden_size, output_size)

    out = thl_ffnn(x, w1, b1, w2, b2, w3, b3)
    jax.block_until_ready(out)

    assert out.shape == (batch, output_size)
    # Softmax rows sum to 1 (tolerance covers the approx EUP reciprocal).
    assert jnp.allclose(jnp.sum(out, axis=1), 1.0, atol=5e-3)
    # Match pure-JAX reference at matching (bf16 matmul) precision.
    ref = thl_ffnn_ref(x, w1, b1, w2, b2, w3, b3)
    assert jnp.allclose(out, ref, atol=2e-2), float(jnp.max(jnp.abs(out - ref)))

    print("KERNEL_OK")
</pallas_src>

<mosaic_0001>
module attributes {stable_mosaic.version = 11 : i64} {
  func.func @thl_ffnn_kernel(%arg0: i32, %arg1: memref<16x128xbf16, #tpu.memory_space<vmem>>, %arg2: memref<128x128xbf16, #tpu.memory_space<vmem>>, %arg3: memref<1x128xf32, #tpu.memory_space<vmem>>, %arg4: memref<128x128xbf16, #tpu.memory_space<vmem>>, %arg5: memref<1x128xf32, #tpu.memory_space<vmem>>, %arg6: memref<128x128xbf16, #tpu.memory_space<vmem>>, %arg7: memref<1x128xf32, #tpu.memory_space<vmem>>, %arg8: memref<16x128xf32, #tpu.memory_space<vmem>>) attributes {dimension_semantics = [#tpu.dimension_semantics<parallel>], iteration_bounds = array<i64: 1>, scalar_prefetch = 0 : i64, scratch_operands = 0 : i64, tpu.core_type = #tpu.core_type<tc>, window_params = [{transform_indices = @transform_0, window_bounds = array<i64: 16, 128>}, {pipeline_mode = #tpu.pipeline_mode<synchronous>, transform_indices = @transform_1, window_bounds = array<i64: 128, 128>}, {pipeline_mode = #tpu.pipeline_mode<synchronous>, transform_indices = @transform_2, window_bounds = array<i64: 1, 128>}, {pipeline_mode = #tpu.pipeline_mode<synchronous>, transform_indices = @transform_3, window_bounds = array<i64: 128, 128>}, {pipeline_mode = #tpu.pipeline_mode<synchronous>, transform_indices = @transform_4, window_bounds = array<i64: 1, 128>}, {pipeline_mode = #tpu.pipeline_mode<synchronous>, transform_indices = @transform_5, window_bounds = array<i64: 128, 128>}, {pipeline_mode = #tpu.pipeline_mode<synchronous>, transform_indices = @transform_6, window_bounds = array<i64: 1, 128>}, {transform_indices = @transform_7, window_bounds = array<i64: 16, 128>}]} {
    %c0 = arith.constant 0 : index
    %c0_0 = arith.constant 0 : index
    %0 = vector.load %arg1[%c0, %c0_0] : memref<16x128xbf16, #tpu.memory_space<vmem>>, vector<16x128xbf16>
    %c0_1 = arith.constant 0 : index
    %c0_2 = arith.constant 0 : index
    %1 = vector.load %arg2[%c0_1, %c0_2] : memref<128x128xbf16, #tpu.memory_space<vmem>>, vector<128x128xbf16>
    %cst = arith.constant dense<0.000000e+00> : vector<16x128xf32>
    %2 = tpu.matmul %0, %1, %cst {dimension_numbers = #tpu.dot_dimension_numbers<[1], [0], [0], [1], [0, 0, 1, 1], [], []>} : vector<16x128xbf16>, vector<128x128xbf16>, vector<16x128xf32> -> vector<16x128xf32>
    %c0_3 = arith.constant 0 : index
    %c0_4 = arith.constant 0 : index
    %3 = vector.load %arg3[%c0_3, %c0_4] : memref<1x128xf32, #tpu.memory_space<vmem>>, vector<1x128xf32>
    %4 = vector.broadcast %3 : vector<1x128xf32> to vector<16x128xf32>
    %5 = arith.addf %2, %4 : vector<16x128xf32>
    %cst_5 = arith.constant 0.000000e+00 : f32
    %6 = vector.broadcast %cst_5 : f32 to vector<16x128xf32>
    %7 = arith.maximumf %5, %6 : vector<16x128xf32>
    %8 = arith.truncf %7 : vector<16x128xf32> to vector<16x128xbf16>
    %c0_6 = arith.constant 0 : index
    %c0_7 = arith.constant 0 : index
    %9 = vector.load %arg4[%c0_6, %c0_7] : memref<128x128xbf16, #tpu.memory_space<vmem>>, vector<128x128xbf16>
    %cst_8 = arith.constant dense<0.000000e+00> : vector<16x128xf32>
    %10 = tpu.matmul %8, %9, %cst_8 {dimension_numbers = #tpu.dot_dimension_numbers<[1], [0], [0], [1], [0, 0, 1, 1], [], []>} : vector<16x128xbf16>, vector<128x128xbf16>, vector<16x128xf32> -> vector<16x128xf32>
    %c0_9 = arith.constant 0 : index
    %c0_10 = arith.constant 0 : index
    %11 = vector.load %arg5[%c0_9, %c0_10] : memref<1x128xf32, #tpu.memory_space<vmem>>, vector<1x128xf32>
    %12 = vector.broadcast %11 : vector<1x128xf32> to vector<16x128xf32>
    %13 = arith.addf %10, %12 : vector<16x128xf32>
    %cst_11 = arith.constant 0.000000e+00 : f32
    %14 = vector.broadcast %cst_11 : f32 to vector<16x128xf32>
    %15 = arith.maximumf %13, %14 : vector<16x128xf32>
    %16 = arith.truncf %15 : vector<16x128xf32> to vector<16x128xbf16>
    %c0_12 = arith.constant 0 : index
    %c0_13 = arith.constant 0 : index
    %17 = vector.load %arg6[%c0_12, %c0_13] : memref<128x128xbf16, #tpu.memory_space<vmem>>, vector<128x128xbf16>
    %cst_14 = arith.constant dense<0.000000e+00> : vector<16x128xf32>
    %18 = tpu.matmul %16, %17, %cst_14 {dimension_numbers = #tpu.dot_dimension_numbers<[1], [0], [0], [1], [0, 0, 1, 1], [], []>} : vector<16x128xbf16>, vector<128x128xbf16>, vector<16x128xf32> -> vector<16x128xf32>
    %c0_15 = arith.constant 0 : index
    %c0_16 = arith.constant 0 : index
    %19 = vector.load %arg7[%c0_15, %c0_16] : memref<1x128xf32, #tpu.memory_space<vmem>>, vector<1x128xf32>
    %20 = vector.broadcast %19 : vector<1x128xf32> to vector<16x128xf32>
    %21 = arith.addf %18, %20 : vector<16x128xf32>
    %cst_17 = arith.constant dense<0xFF800000> : vector<16xf32>
    %22 = vector.multi_reduction <maximumf>, %21, %cst_17 [1] : vector<16x128xf32> to vector<16xf32>
    %23 = vector.shape_cast %22 : vector<16xf32> to vector<16x1xf32>
    %24 = vector.broadcast %23 : vector<16x1xf32> to vector<16x128xf32>
    %25 = arith.subf %21, %24 : vector<16x128xf32>
    %26 = math.exp %25 : vector<16x128xf32>
    %cst_18 = arith.constant dense<0.000000e+00> : vector<16xf32>
    %27 = vector.multi_reduction <add>, %26, %cst_18 [1] : vector<16x128xf32> to vector<16xf32>
    %28 = vector.shape_cast %27 : vector<16xf32> to vector<16x1xf32>
    %29 = tpu.reciprocal %28 {approx = true} : vector<16x1xf32> -> vector<16x1xf32>
    %30 = vector.broadcast %29 : vector<16x1xf32> to vector<16x128xf32>
    %31 = arith.mulf %26, %30 : vector<16x128xf32>
    %c0_19 = arith.constant 0 : index
    %c0_20 = arith.constant 0 : index
    %32 = vector.load %arg8[%c0_19, %c0_20] : memref<16x128xf32, #tpu.memory_space<vmem>>, vector<16x128xf32>
    tpu.vector_store %arg8[%c0_19, %c0_20], %31 {strides = array<i32>} : memref<16x128xf32, #tpu.memory_space<vmem>>, vector<16x128xf32>,
    return
  }
  func.func @transform_0(%arg0: i32) -> (i32, i32) {
    %c0_i32 = arith.constant 0 : i32
    %c0_i32_0 = arith.constant 0 : i32
    return %arg0, %c0_i32 : i32, i32
  }
  func.func @transform_1(%arg0: i32) -> (i32, i32) {
    %c0_i32 = arith.constant 0 : i32
    %c0_i32_0 = arith.constant 0 : i32
    %c0_i32_1 = arith.constant 0 : i32
    return %c0_i32, %c0_i32_0 : i32, i32
  }
  func.func @transform_2(%arg0: i32) -> (i32, i32) {
    %c0_i32 = arith.constant 0 : i32
    %c0_i32_0 = arith.constant 0 : i32
    %c0_i32_1 = arith.constant 0 : i32
    return %c0_i32, %c0_i32_0 : i32, i32
  }
  func.func @transform_3(%arg0: i32) -> (i32, i32) {
    %c0_i32 = arith.constant 0 : i32
    %c0_i32_0 = arith.constant 0 : i32
    %c0_i32_1 = arith.constant 0 : i32
    return %c0_i32, %c0_i32_0 : i32, i32
  }
  func.func @transform_4(%arg0: i32) -> (i32, i32) {
    %c0_i32 = arith.constant 0 : i32
    %c0_i32_0 = arith.constant 0 : i32
    %c0_i32_1 = arith.constant 0 : i32
    return %c0_i32, %c0_i32_0 : i32, i32
  }
  func.func @transform_5(%arg0: i32) -> (i32, i32) {
    %c0_i32 = arith.constant 0 : i32
    %c0_i32_0 = arith.constant 0 : i32
    %c0_i32_1 = arith.constant 0 : i32
    return %c0_i32, %c0_i32_0 : i32, i32
  }
  func.func @transform_6(%arg0: i32) -> (i32, i32) {
    %c0_i32 = arith.constant 0 : i32
    %c0_i32_0 = arith.constant 0 : i32
    %c0_i32_1 = arith.constant 0 : i32
    return %c0_i32, %c0_i32_0 : i32, i32
  }
  func.func @transform_7(%arg0: i32) -> (i32, i32) {
    %c0_i32 = arith.constant 0 : i32
    %c0_i32_0 = arith.constant 0 : i32
    return %arg0, %c0_i32 : i32, i32
  }
}

</mosaic_0001>

<bundles_post_ra>
// kernel: thl_ffnn.1
= control target key start
LH: loop header
LB: loop body
LE: loop exit
PB: predicated region body
PF: predicated region fallthrough
CT: control target
= control target key end

     0   :  { %s576_s1 = inlined_call_operand.vmem [shape: bf16[128,128], index: 1, kind: input, shape index: {}]   ;;  %s577_s3 = inlined_call_operand.vmem [shape: bf16[128,128], index: 3, kind: input, shape index: {}]   ;;  %s578_s2 = inlined_call_operand.vmem [shape: f32[1,128], index: 2, kind: input, shape index: {}]   ;;  %s579_s0 = inlined_call_operand.vmem [shape: bf16[16,128], index: 0, kind: input, shape index: {}]   ;;  %s580_s4 = inlined_call_operand.vmem [shape: f32[1,128], index: 4, kind: input, shape index: {}]   ;;  %s581_s5 = inlined_call_operand.vmem [shape: bf16[128,128], index: 5, kind: input, shape index: {}]   ;;  %s582_s6 = inlined_call_operand.vmem [shape: f32[1,128], index: 6, kind: input, shape index: {}]   ;;  %s583_s7 = inlined_call_operand.vmem [shape: f32[16,128], index: 7, kind: output, shape index: {}]  }
   0x1   :  { %v418_v0 = vld [vmem:[%s576_s1 + $0x38] sm:$0xff]  ;;  %v417_v1 = vld [vmem:[%s576_s1 + $0x30] sm:$0xff]  ;;  %v416_v4 = vld [vmem:[%s576_s1 + $0x28] sm:$0xff] }
   0x2   :  { %102 = vmatpush.bf16.msra.mxu0 %v418_v0  ;;  %v426_v2 = vld [vmem:[%s577_s3 + $0x38] sm:$0xff]  ;;  %v425_v3 = vld [vmem:[%s577_s3 + $0x30] sm:$0xff]  ;;  %v424_v5 = vld [vmem:[%s577_s3 + $0x28] sm:$0xff] }
   0x3   :  { %187 = vmatpush.bf16.msra.mxu1 %v426_v2  ;;  %v415_v6 = vld [vmem:[%s576_s1 + $0x20] sm:$0xff]  ;;  %v414_v8 = vld [vmem:[%s576_s1 + $0x18] sm:$0xff]  ;;  %v413_v9 = vld [vmem:[%s576_s1 + $0x10] sm:$0xff] }
   0x4   :  { %v423_v7 = vld [vmem:[%s577_s3 + $0x20] sm:$0xff]  ;;  %v412_v10 = vld [vmem:[%s576_s1 + $0x8] sm:$0xff]  ;;  %v422_v13 = vld [vmem:[%s577_s3 + $0x18] sm:$0xff] }
   0x5   :  { %v411_v11 = vld [vmem:[%s576_s1] sm:$0xff]  ;;  %v421_v14 = vld [vmem:[%s577_s3 + $0x10] sm:$0xff]  ;;  %v420_v15 = vld [vmem:[%s577_s3 + $0x8] sm:$0xff] }
   0x6   :  { %103 = vmatpush.bf16.msra.mxu0 %v417_v1  ;;  %v410_v12 = vld [vmem:[%s579_s0] sm:$0xff]  ;;  %v434_v17 = vld [vmem:[%s581_s5 + $0x38] sm:$0xff]  ;;  %v433_v18 = vld [vmem:[%s581_s5 + $0x30] sm:$0xff] }
   0x7   :  { %188 = vmatpush.bf16.msra.mxu1 %v425_v3  ;;  %v419_v16 = vld [vmem:[%s577_s3] sm:$0xff]  ;;  %272 = vmatpush.bf16.msra.mxu2 %v434_v17  ;;  %v432_v19 = vld [vmem:[%s581_s5 + $0x28] sm:$0xff]  ;;  %v430_v29 = vld [vmem:[%s581_s5 + $0x18] sm:$0xff] }
   0x8   :  { %v431_v20 = vld [vmem:[%s581_s5 + $0x20] sm:$0xff]  ;;  %v429_v30 = vld [vmem:[%s581_s5 + $0x10] sm:$0xff]  ;;  %v428_v31 = vld [vmem:[%s581_s5 + $0x8] sm:$0xff] }
   0x9   :  { %v435_v22 = vld [vmem:[%s578_s2] ss:$0 sm:$0xff] }
   0xa   :  { %104 = vmatpush.bf16.msra.mxu0 %v416_v4  ;;  %v427_v32 = vld [vmem:[%s581_s5] sm:$0xff] }
   0xb   :  { %189 = vmatpush.bf16.msra.mxu1 %v424_v5  ;;  %273 = vmatpush.bf16.msra.mxu2 %v433_v18  ;;  %v436_v34 = vld [vmem:[%s580_s4] ss:$0 sm:$0xff] }
   0xc   :  { %v437_v41 = vld [vmem:[%s582_s6] ss:$0 sm:$0xff] }
   0xe   :  { %105 = vmatpush.bf16.msra.mxu0 %v415_v6 }
   0xf   :  { %190 = vmatpush.bf16.msra.mxu1 %v423_v7  ;;  %274 = vmatpush.bf16.msra.mxu2 %v432_v19 }
  0x12   :  { %106 = vmatpush.bf16.msra.mxu0 %v414_v8 }
  0x13   :  { %191 = vmatpush.bf16.msra.mxu1 %v422_v13  ;;  %275 = vmatpush.bf16.msra.mxu2 %v431_v20 }
  0x16   :  { %107 = vmatpush.bf16.msra.mxu0 %v413_v9 }
  0x17   :  { %192 = vmatpush.bf16.msra.mxu1 %v421_v14  ;;  %276 = vmatpush.bf16.msra.mxu2 %v430_v29 }
  0x1a   :  { %108 = vmatpush.bf16.msra.mxu0 %v412_v10 }
  0x1b   :  { %193 = vmatpush.bf16.msra.mxu1 %v420_v15  ;;  %277 = vmatpush.bf16.msra.mxu2 %v429_v30 }
  0x1e   :  { %109 = vmatpush.bf16.msra.mxu0 %v411_v11 }
  0x1f   :  { %194 = vmatpush.bf16.msra.mxu1 %v419_v16  ;;  %278 = vmatpush.bf16.msra.mxu2 %v428_v31 }
  0x21   :  { %110 = vmatmul.bf16.vlgmr.msra.gmra.mxu0 %v410_v12 }
  0x23   :  { %279 = vmatpush.bf16.msra.mxu2 %v427_v32 }
  0x9e   :  { %v111_v21 = vpop.f32.mrf.mxu0 }
  0x9f   :  { %v112_v23 = vadd.f32 %v435_v22, %v111_v21 }
  0xa1   :  { %v116_v26 = vmax.f32 %v112_v23, 0.0 }
  0xa6   :  { %v113_v24 = vpop.f32.mrf.mxu0 }
  0xa7   :  { %v114_v25 = vadd.f32 %v435_v22, %v113_v24 }
  0xa9   :  { %v117_v27 = vmax.f32 %v114_v25, 0.0 }
  0xab   :  { %v118_v28 = vpack.c.bf16 %v117_v27, %v116_v26 }
  0xad   :  { %195 = vmatmul.bf16.vlgmr.msra.gmra.mxu1 %v118_v28 }
 0x12a   :  { %v196_v33 = vpop.f32.mrf.mxu1 }
 0x12b   :  { %v197_v35 = vadd.f32 %v436_v34, %v196_v33 }
 0x12d   :  { %v201_v38 = vmax.f32 %v197_v35, 0.0 }
 0x132   :  { %v198_v36 = vpop.f32.mrf.mxu1 }
 0x133   :  { %v199_v37 = vadd.f32 %v436_v34, %v198_v36 }
 0x135   :  { %v202_v39 = vmax.f32 %v199_v37, 0.0 }
 0x137   :  { %v203_v40 = vpack.c.bf16 %v202_v39, %v201_v38 }
 0x139   :  { %280 = vmatmul.bf16.vlgmr.msra.gmra.mxu2 %v203_v40 }
 0x1bc   :  { %v281_v42 = vpop.f32.mrf.mxu2 }
 0x1bd   :  { %v282_v43 = vadd.f32 %v437_v41, %v281_v42 }
 0x1bf   :  { %286 = vmax.xlane.f32.xlu0 %v282_v43 }
 0x1c4   :  { %v283_v44 = vpop.f32.mrf.mxu2 }
 0x1c5   :  { %v284_v45 = vadd.f32 %v437_v41, %v283_v44 }
 0x1c7   :  { %288 = vmax.xlane.f32.xlu0 %v284_v45 }
 0x232   :  { %v287_v46 = vpop.xlane.xlu0 %286 }
 0x233   :  { %v290_v47 = vsub.f32 %v282_v43, %v287_v46 }
 0x235   :  { %v292_v48 = vmul.f32 1.442695, %v290_v47 }
 0x237   :  { %438 = vpow2.f32 %v292_v48 }
 0x23a   :  { %v289_v49 = vpop.xlane.xlu0 %288 }
 0x23b   :  { %v291_v50 = vsub.f32 %v284_v45, %v289_v49 }
 0x23d   :  { %v439_v51 = vpop.eup %438  ;;  %v294_v52 = vmul.f32 1.442695, %v291_v50 }
 0x23e   :  { %296 = vadd.xlane.f32.xlu1 %v439_v51 }
 0x23f   :  { %440 = vpow2.f32 %v294_v52 }
 0x245   :  { %v441_v53 = vpop.eup %440 }
 0x246   :  { %298 = vadd.xlane.f32.xlu1 %v441_v53 }
 0x2b1   :  { %v297_v54 = vpop.xlane.xlu1 %296 }
 0x2b2   :  { %442 = vrcp.f32 %v297_v54 }
 0x2b8   :  { %v443_v55 = vpop.eup %442 }
 0x2b9   :  { %v302_v56 = vmul.f32 %v443_v55, %v439_v51  ;;  %v299_v57 = vpop.xlane.xlu1 %298 }
 0x2ba   :  { %444 = vrcp.f32 %v299_v57 }
 0x2bb   :  { %304 = vst [vmem:[%s583_s7] sm:$0xff] %v302_v56 }
 0x2c0   :  { %v445_v58 = vpop.eup %444 }
 0x2c1   :  { %v303_v59 = vmul.f32 %v445_v58, %v441_v53 }
 0x2c3   :  { %305 = vst [vmem:[%s583_s7 + $0x8] sm:$0xff] %v303_v59 }

</bundles_post_ra>
